<compile_context>
chip_gen: v6e
topology: v6e:2x2x1
jax: 0.10.0
libtpu: 0.0.40
codegen_flags: <defaults>
</compile_context>

<pallas_src>
import functools

import jax
import jax.numpy as jnp
from jax import lax
from jax.experimental import pallas as pl
from jax.experimental.pallas import tpu as pltpu

_LANE = 128


def _channel_layernorm_kernel(x_ref, p_ref, o_ref, *, eps):
    # x_ref: (bt, C, tn) block. Channels on the sublane axis, the padded
    # flattened spatial axis on the 128-lane axis -> lane-dense loads/stores.
    x = x_ref[...].astype(jnp.float32)                       # (bt, C, tn)
    mean = jnp.mean(x, axis=1, keepdims=True)                # (bt, 1, tn)
    centered = x - mean
    # torch.var(..., unbiased=False) == biased variance (two-pass: numerically safe).
    var = jnp.mean(centered * centered, axis=1, keepdims=True)
    inv = lax.rsqrt(var + eps)                               # EUP slot (free-ish)
    g = p_ref[0]                                             # (C, 1) float32
    b = p_ref[1]                                             # (C, 1) float32
    o_ref[...] = (centered * inv * g + b).astype(o_ref.dtype)


def _vmem_capacity_bytes():
    try:
        return int(pltpu.get_tpu_info().vmem_capacity_bytes)
    except Exception:
        return 64 << 20  # conservative fallback (v7x per-TC VMEM)


def _sublane_multiple(itemsize):
    # f32 -> 8 sublanes per vreg, bf16 -> 16, int8/fp8 -> 32 (packing).
    return max(8, 32 // max(1, itemsize))


def _pick_tiles(batch, c_pad, n_pad, itemsize, vmem_cap):
    """Pick (batch_tile, lane_tile) for an x block of shape (bt, C, tn).

    Per-element VMEM accounting for one block:
      * double-buffered input block  : 2 * itemsize
      * double-buffered output block : 2 * itemsize
      * ~3 whole-block f32 temporaries in the body (cast, centered, result)
    `c_pad` is the channel count rounded up to the sublane tile so padding
    waste is reflected in the budget.
    """
    bytes_per_elem = 4 * itemsize + 3 * 4
    min_block_elems = c_pad * _LANE
    budget = max(bytes_per_elem * min_block_elems, int(0.4 * vmem_cap))
    max_elems = budget // bytes_per_elem

    # Spatial tile: largest multiple of 128 dividing n_pad that fits with bt=1.
    lanes = n_pad // _LANE
    tl = 1
    for d in range(lanes, 0, -1):
        if lanes % d == 0 and c_pad * d * _LANE <= max_elems:
            tl = d
            break
    tn = tl * _LANE

    # Batch tile: largest divisor of `batch` whose block still fits.
    bt = 1
    for d in range(batch, 0, -1):
        if batch % d == 0 and d * c_pad * tn <= max_elems:
            bt = d
            break
    return bt, tn


def prenorm_pallas(x_nchw, g, b, fn=None, *, eps=1e-5):
    """PreNorm forward: fn(channel-LayerNorm(x)).

    x_nchw : (B, C, H, W)
    g, b   : (1, C, 1, 1)  (PyTorch parameter shapes)
    fn     : the wrapped sub-module as a JAX callable (identity if None).
    """
    B, C, H, W = x_nchw.shape
    N = H * W
    n_pad = max(_LANE, -(-N // _LANE) * _LANE)  # lane-dense stores (no vst.msk)

    # Free, contiguous reshape (no transpose): spatial goes to the lane axis.
    x_flat = x_nchw.reshape(B, C, N)
    padded = n_pad != N
    if padded:
        x_flat = jnp.pad(x_flat, ((0, 0), (0, 0), (0, n_pad - N)))

    # (2, C, 1): row 0 = gamma, row 1 = beta. Channels on the sublane axis so
    # they broadcast over (bt, C, tn) without any in-kernel layout moves.
    params = jnp.concatenate(
        [g.reshape(1, C, 1), b.reshape(1, C, 1)], axis=0
    ).astype(jnp.float32)

    itemsize = x_flat.dtype.itemsize
    c_pad = -(-C // _sublane_multiple(itemsize)) * _sublane_multiple(itemsize)
    vmem_cap = _vmem_capacity_bytes()
    bt, tn = _pick_tiles(B, c_pad, n_pad, itemsize, vmem_cap)
    vmem_limit = int(max(32 << 20, min(vmem_cap * 3 // 4, 96 << 20)))

    kernel = functools.partial(_channel_layernorm_kernel, eps=eps)

    # Only alias the output onto the input HBM buffer when we own a freshly
    # padded buffer (safe to overwrite without affecting the caller's x).
    io_alias = {0: 0} if padded else {}

    normed = pl.pallas_call(
        kernel,
        out_shape=jax.ShapeDtypeStruct((B, C, n_pad), x_flat.dtype),
        grid=(B // bt, n_pad // tn),
        in_specs=[
            pl.BlockSpec((bt, C, tn), lambda i, j: (i, 0, j)),
            pl.BlockSpec((2, C, 1), lambda i, j: (0, 0, 0)),
        ],
        out_specs=pl.BlockSpec((bt, C, tn), lambda i, j: (i, 0, j)),
        input_output_aliases=io_alias,
        compiler_params=pltpu.CompilerParams(
            dimension_semantics=("parallel", "parallel"),
            vmem_limit_bytes=vmem_limit,
        ),
    )(x_flat, params)

    if padded:
        normed = normed[:, :, :N]
    normed = normed.reshape(B, C, H, W)
    # TODO(synk): the real structural win is fusing this norm into the prologue
    # of `fn`'s first kernel; here `fn` stays an arbitrary JAX callable.
    return normed if fn is None else fn(normed)


def prenorm_reference(x, g, b, fn=None, *, eps=1e-5):
    """Pure-JAX re-implementation of the PyTorch forward, for verification."""
    mean = jnp.mean(x, axis=1, keepdims=True)
    var = jnp.mean((x - mean) ** 2, axis=1, keepdims=True)  # unbiased=False
    y = (x - mean) / jnp.sqrt(var + eps) * g + b
    return y if fn is None else fn(y)


if __name__ == "__main__":
    fn = lambda t: t  # PreNorm wraps an arbitrary sub-module; identity here.

    key = jax.random.PRNGKey(0)

    # Case 1: lane-aligned spatial size (16*16 = 256).
    B, C, H, W = 2, 4, 16, 16
    kx, kg, kb, key = jax.random.split(key, 4)
    x = jax.random.normal(kx, (B, C, H, W), dtype=jnp.float32)
    g = 1.0 + 0.1 * jax.random.normal(kg, (1, C, 1, 1), dtype=jnp.float32)
    b = 0.05 * jax.random.normal(kb, (1, C, 1, 1), dtype=jnp.float32)

    run = jax.jit(lambda xx, gg, bb: prenorm_pallas(xx, gg, bb, fn))
    out = jax.block_until_ready(run(x, g, b))
    ref = jax.block_until_ready(prenorm_reference(x, g, b, fn))
    assert out.shape == (B, C, H, W), out.shape
    assert jnp.allclose(out, ref, atol=1e-4, rtol=1e-4), (
        f"max abs err = {jnp.max(jnp.abs(out - ref))}"
    )

    # Case 2: ragged spatial size (14*14 = 196) -> exercises the pad + alias path.
    B2, C2, H2, W2 = 1, 8, 14, 14
    kx2, kg2, kb2, key = jax.random.split(key, 4)
    x2 = jax.random.normal(kx2, (B2, C2, H2, W2), dtype=jnp.float32)
    g2 = 1.0 + 0.1 * jax.random.normal(kg2, (1, C2, 1, 1), dtype=jnp.float32)
    b2 = 0.05 * jax.random.normal(kb2, (1, C2, 1, 1), dtype=jnp.float32)

    run2 = jax.jit(lambda xx, gg, bb: prenorm_pallas(xx, gg, bb, fn))
    out2 = jax.block_until_ready(run2(x2, g2, b2))
    ref2 = jax.block_until_ready(prenorm_reference(x2, g2, b2, fn))
    assert out2.shape == (B2, C2, H2, W2), out2.shape
    assert jnp.allclose(out2, ref2, atol=1e-4, rtol=1e-4), (
        f"max abs err = {jnp.max(jnp.abs(out2 - ref2))}"
    )

    print("KERNEL_OK")
</pallas_src>

<mosaic_0001>
module attributes {stable_mosaic.version = 11 : i64} {
  func.func @_channel_layernorm_kernel(%arg0: i32, %arg1: i32, %arg2: memref<2x4x256xf32, #tpu.memory_space<vmem>>, %arg3: memref<2x4x1xf32, #tpu.memory_space<vmem>>, %arg4: memref<2x4x256xf32, #tpu.memory_space<vmem>>) attributes {dimension_semantics = [#tpu.dimension_semantics<parallel>, #tpu.dimension_semantics<parallel>], iteration_bounds = array<i64: 1, 1>, scalar_prefetch = 0 : i64, scratch_operands = 0 : i64, tpu.core_type = #tpu.core_type<tc>, window_params = [{transform_indices = @transform_0, window_bounds = array<i64: 2, 4, 256>}, {pipeline_mode = #tpu.pipeline_mode<synchronous>, transform_indices = @transform_1, window_bounds = array<i64: 2, 4, 1>}, {transform_indices = @transform_2, window_bounds = array<i64: 2, 4, 256>}]} {
    %c0 = arith.constant 0 : index
    %c0_0 = arith.constant 0 : index
    %c0_1 = arith.constant 0 : index
    %0 = vector.load %arg2[%c0, %c0_0, %c0_1] : memref<2x4x256xf32, #tpu.memory_space<vmem>>, vector<2x4x256xf32>
    %cst = arith.constant dense<0.000000e+00> : vector<2x256xf32>
    %1 = vector.multi_reduction <add>, %0, %cst [1] : vector<2x4x256xf32> to vector<2x256xf32>
    %2 = vector.shape_cast %1 : vector<2x256xf32> to vector<2x1x256xf32>
    %cst_2 = arith.constant 4.000000e+00 : f32
    %3 = vector.broadcast %cst_2 : f32 to vector<2x1x256xf32>
    %4 = arith.divf %2, %3 : vector<2x1x256xf32>
    %5 = vector.broadcast %4 : vector<2x1x256xf32> to vector<2x4x256xf32>
    %6 = arith.subf %0, %5 : vector<2x4x256xf32>
    %7 = arith.mulf %6, %6 : vector<2x4x256xf32>
    %cst_3 = arith.constant dense<0.000000e+00> : vector<2x256xf32>
    %8 = vector.multi_reduction <add>, %7, %cst_3 [1] : vector<2x4x256xf32> to vector<2x256xf32>
    %9 = vector.shape_cast %8 : vector<2x256xf32> to vector<2x1x256xf32>
    %cst_4 = arith.constant 4.000000e+00 : f32
    %10 = vector.broadcast %cst_4 : f32 to vector<2x1x256xf32>
    %11 = arith.divf %9, %10 : vector<2x1x256xf32>
    %cst_5 = arith.constant 9.99999974E-6 : f32
    %12 = vector.broadcast %cst_5 : f32 to vector<2x1x256xf32>
    %13 = arith.addf %11, %12 : vector<2x1x256xf32>
    %14 = math.rsqrt %13 : vector<2x1x256xf32>
    %c0_6 = arith.constant 0 : index
    %c0_7 = arith.constant 0 : index
    %c0_8 = arith.constant 0 : index
    %15 = vector.load %arg3[%c0_6, %c0_7, %c0_8] : memref<2x4x1xf32, #tpu.memory_space<vmem>>, vector<1x4x1xf32>
    %16 = vector.shape_cast %15 : vector<1x4x1xf32> to vector<4x1xf32>
    %c1 = arith.constant 1 : index
    %c0_9 = arith.constant 0 : index
    %c0_10 = arith.constant 0 : index
    %17 = vector.load %arg3[%c1, %c0_9, %c0_10] : memref<2x4x1xf32, #tpu.memory_space<vmem>>, vector<1x4x1xf32>
    %18 = vector.shape_cast %17 : vector<1x4x1xf32> to vector<4x1xf32>
    %19 = vector.broadcast %14 : vector<2x1x256xf32> to vector<2x4x256xf32>
    %20 = arith.mulf %6, %19 : vector<2x4x256xf32>
    %21 = vector.shape_cast %16 : vector<4x1xf32> to vector<1x4x1xf32>
    %22 = vector.broadcast %21 : vector<1x4x1xf32> to vector<2x4x256xf32>
    %23 = arith.mulf %20, %22 : vector<2x4x256xf32>
    %24 = vector.shape_cast %18 : vector<4x1xf32> to vector<1x4x1xf32>
    %25 = vector.broadcast %24 : vector<1x4x1xf32> to vector<2x4x256xf32>
    %26 = arith.addf %23, %25 : vector<2x4x256xf32>
    %c0_11 = arith.constant 0 : index
    %c0_12 = arith.constant 0 : index
    %c0_13 = arith.constant 0 : index
    %27 = vector.load %arg4[%c0_11, %c0_12, %c0_13] : memref<2x4x256xf32, #tpu.memory_space<vmem>>, vector<2x4x256xf32>
    tpu.vector_store %arg4[%c0_11, %c0_12, %c0_13], %26 {strides = array<i32>} : memref<2x4x256xf32, #tpu.memory_space<vmem>>, vector<2x4x256xf32>,
    return
  }
  func.func @transform_0(%arg0: i32, %arg1: i32) -> (i32, i32, i32) {
    %c0_i32 = arith.constant 0 : i32
    %c0_i32_0 = arith.constant 0 : i32
    return %arg0, %c0_i32, %arg1 : i32, i32, i32
  }
  func.func @transform_1(%arg0: i32, %arg1: i32) -> (i32, i32, i32) {
    %c0_i32 = arith.constant 0 : i32
    %c0_i32_0 = arith.constant 0 : i32
    %c0_i32_1 = arith.constant 0 : i32
    %c0_i32_2 = arith.constant 0 : i32
    return %c0_i32, %c0_i32_0, %c0_i32_1 : i32, i32, i32
  }
  func.func @transform_2(%arg0: i32, %arg1: i32) -> (i32, i32, i32) {
    %c0_i32 = arith.constant 0 : i32
    %c0_i32_0 = arith.constant 0 : i32
    return %arg0, %c0_i32, %arg1 : i32, i32, i32
  }
}

</mosaic_0001>

<bundles_post_ra>
// kernel: _lambda_.1
= control target key start
LH: loop header
LB: loop body
LE: loop exit
PB: predicated region body
PF: predicated region fallthrough
CT: control target
= control target key end

     0   :  { %v172_v0 = vmov 0   ;;  %vm19_vm0 = vcmask 1043456   ;;  %s215_s1 = inlined_call_operand.vmem [shape: f32[2,4,1], index: 1, kind: input, shape index: {}]   ;;  %s216_s0 = inlined_call_operand.vmem [shape: f32[2,4,256], index: 0, kind: input, shape index: {}]   ;;  %s217_s2 = inlined_call_operand.vmem [shape: f32[2,4,256], index: 2, kind: output, shape index: {}]  }
   0x1   :  { %161 = vset.pattern.permute.xlu0 %v172_v0  ;;  %v111_v1 = vld [vmem:[%s215_s1] sm:$0xf]  ;;  %v158_v2 = vld [vmem:[%s215_s1 + $0x4] sm:$0xf]  ;;  %v12_v4 = vld [vmem:[%s216_s0 + $0x8] sm:$0xff] }
   0x2   :  { %126 = vperm.xlu0 %161, %v111_v1   ;;  %v11_v3 = vld [vmem:[%s216_s0] sm:$0xff]  ;;  %v16_v6 = vcombine.high %v12_v4, %v12_v4  ;;  %v34_v9 = vsel %vm19_vm0, %v12_v4, 0.0 }
   0x3   :  { %v15_v5 = vcombine.high %v11_v3, %v11_v3  ;;  %v20_v7 = vsel %vm19_vm0, %v11_v3, 0.0  ;;  %v35_v13 = vrot.slane %v34_v9, 4 }
   0x4   :  { %v41_v10 = vsel %vm19_vm0, %v16_v6, 0.0  ;;  %v21_v11 = vrot.slane %v20_v7, 4 }
   0x5   :  { %v27_v8 = vsel %vm19_vm0, %v15_v5, 0.0  ;;  %v42_v14 = vrot.slane %v41_v10, 4  ;;  %v36_v17 = vadd.f32 %v35_v13, %v34_v9 }
   0x6   :  { %140 = vperm.xlu0 %161, %v158_v2   ;;  %v28_v12 = vrot.slane %v27_v8, 4  ;;  %v22_v15 = vadd.f32 %v21_v11, %v20_v7 }
   0x7   :  { %v43_v18 = vadd.f32 %v42_v14, %v41_v10  ;;  %v37_v21 = vrot.slane %v36_v17, 2 }
   0x8   :  { %v29_v16 = vadd.f32 %v28_v12, %v27_v8  ;;  %v23_v19 = vrot.slane %v22_v15, 2 }
   0x9   :  { %v44_v22 = vrot.slane %v43_v18, 2  ;;  %v38_v25 = vadd.f32 %v37_v21, %v36_v17  ;;  %v131_v21 = vlaneseq }
   0xa   :  { %v30_v20 = vrot.slane %v29_v16, 2  ;;  %v24_v23 = vadd.f32 %v23_v19, %v22_v15  ;;  %v173_v19 = vmov 839922192  }
   0xb   :  { %v45_v26 = vadd.f32 %v44_v22, %v43_v18  ;;  %v39_v29 = vrot.slane %v38_v25, 1 }
   0xc   :  { %v31_v24 = vadd.f32 %v30_v20, %v29_v16  ;;  %v25_v27 = vrot.slane %v24_v23, 1  ;;  %v129_v20 = vunpack.c.l.s4 %v173_v19 }
   0xd   :  { %v46_v30 = vrot.slane %v45_v26, 1  ;;  %v40_v33 = vadd.f32 %v39_v29, %v38_v25 }
   0xe   :  { %v32_v28 = vrot.slane %v31_v24, 1  ;;  %v26_v31 = vadd.f32 %v25_v27, %v24_v23  ;;  %v130_v25 = vunpack.c.0.s8 %v129_v20 }
   0xf   :  { %v47_v34 = vadd.f32 %v46_v30, %v45_v26  ;;  %v51_v37 = vmul.f32 0.25, %v40_v33  ;;  %v132_v26 = vshrl.u32 %v131_v21, 7 }
  0x10   :  { %v33_v32 = vadd.f32 %v32_v28, %v31_v24  ;;  %v49_v35 = vmul.f32 0.25, %v26_v31 }
  0x11   :  { %v52_v38 = vmul.f32 0.25, %v47_v34  ;;  %v133_v28 = vsub.s32 %v130_v25, %v132_v26 }
  0x12   :  { %v50_v36 = vmul.f32 0.25, %v33_v32 }
  0x13   :  { %v58_v40 = vcombine.low %v51_v37, %v52_v38 }
  0x14   :  { %v57_v39 = vcombine.low %v49_v35, %v50_v36 }
  0x15   :  { %v62_v42 = vsub.f32 %v12_v4, %v58_v40 }
  0x16   :  { %v61_v41 = vsub.f32 %v11_v3, %v57_v39 }
  0x17   :  { %v64_v44 = vmul.f32 %v62_v42, %v62_v42 }
  0x18   :  { %v63_v43 = vmul.f32 %v61_v41, %v61_v41 }
  0x19   :  { %v68_v46 = vcombine.high %v64_v44, %v64_v44  ;;  %v85_v48 = vsel %vm19_vm0, %v64_v44, 0.0 }
  0x1a   :  { %v67_v45 = vcombine.high %v63_v43, %v63_v43  ;;  %v71_v47 = vsel %vm19_vm0, %v63_v43, 0.0  ;;  %v86_v52 = vrot.slane %v85_v48, 4 }
  0x1b   :  { %v72_v50 = vrot.slane %v71_v47, 4  ;;  %v92_v51 = vsel %vm19_vm0, %v68_v46, 0.0 }
  0x1c   :  { %v78_v49 = vsel %vm19_vm0, %v67_v45, 0.0  ;;  %v93_v54 = vrot.slane %v92_v51, 4  ;;  %v87_v56 = vadd.f32 %v86_v52, %v85_v48 }
  0x1d   :  { %v79_v53 = vrot.slane %v78_v49, 4  ;;  %v73_v55 = vadd.f32 %v72_v50, %v71_v47 }
  0x1e   :  { %v94_v58 = vadd.f32 %v93_v54, %v92_v51  ;;  %v88_v60 = vrot.slane %v87_v56, 2 }
  0x1f   :  { %v80_v57 = vadd.f32 %v79_v53, %v78_v49  ;;  %v74_v59 = vrot.slane %v73_v55, 2 }
  0x20   :  { %v95_v62 = vrot.slane %v94_v58, 2  ;;  %v89_v0 = vadd.f32 %v88_v60, %v87_v56 }
  0x21   :  { %v81_v61 = vrot.slane %v80_v57, 2  ;;  %v75_v63 = vadd.f32 %v74_v59, %v73_v55 }
  0x22   :  { %v96_v2 = vadd.f32 %v95_v62, %v94_v58  ;;  %v90_v4 = vrot.slane %v89_v0, 1 }
  0x23   :  { %v82_v1 = vadd.f32 %v81_v61, %v80_v57  ;;  %v76_v3 = vrot.slane %v75_v63, 1 }
  0x24   :  { %v97_v6 = vrot.slane %v96_v2, 1  ;;  %v91_v8 = vadd.f32 %v90_v4, %v89_v0 }
  0x25   :  { %v83_v5 = vrot.slane %v82_v1, 1  ;;  %v77_v7 = vadd.f32 %v76_v3, %v75_v63 }
  0x26   :  { %v98_v10 = vadd.f32 %v97_v6, %v96_v2  ;;  %v101_v12 = vmul.f32 0.25, %v91_v8 }
  0x27   :  { %v84_v9 = vadd.f32 %v83_v5, %v82_v1  ;;  %v99_v11 = vmul.f32 0.25, %v77_v7 }
  0x28   :  { %v102_v14 = vmul.f32 0.25, %v98_v10  ;;  %v105_v16 = vadd.f32 1e-05, %v101_v12 }
  0x29   :  { %v100_v13 = vmul.f32 0.25, %v84_v9  ;;  %v103_v15 = vadd.f32 1e-05, %v99_v11 }
  0x2a   :  { %v106_v18 = vadd.f32 1e-05, %v102_v14 }
  0x2b   :  { %v104_v17 = vadd.f32 1e-05, %v100_v13  ;;  %164 = vrsqrt.f32 %v103_v15 }
  0x2c   :  { %166 = vrsqrt.f32 %v105_v16 }
  0x2d   :  { %168 = vrsqrt.f32 %v104_v17 }
  0x2e   :  { %170 = vrsqrt.f32 %v106_v18 }
  0x38   :  { %v165_v22 = vpop.eup %164 }
  0x39   :  { %v167_v23 = vpop.eup %166 }
  0x3a   :  { %v169_v24 = vpop.eup %168 }
  0x3b   :  { %v171_v27 = vpop.eup %170  ;;  %v118_v29 = vcombine.low %v165_v22, %v169_v24 }
  0x3c   :  { %v119_v30 = vcombine.low %v167_v23, %v171_v27 }
  0x3d   :  { %v122_v32 = vmul.f32 %v118_v29, %v61_v41 }
  0x3e   :  { %v123_v33 = vmul.f32 %v119_v30, %v62_v42 }
  0x7d   :  { %v127_v31 = vpop.permute.xlu0 %126 }
  0x7e   :  { %v134_v34 = vrot.slane %v127_v31, %v133_v28 }
  0x80   :  { %v136_v36 = vmul.f32 %v134_v34, %v122_v32  ;;  %v137_v37 = vmul.f32 %v134_v34, %v123_v33 }
  0x81   :  { %v141_v35 = vpop.permute.xlu0 %140 }
  0x82   :  { %v148_v38 = vrot.slane %v141_v35, %v133_v28 }
  0x84   :  { %v150_v39 = vadd.f32 %v148_v38, %v136_v36  ;;  %v151_v40 = vadd.f32 %v148_v38, %v137_v37 }
  0x86   :  { %152 = vst [vmem:[%s217_s2] sm:$0xff] %v150_v39  ;;  %153 = vst [vmem:[%s217_s2 + $0x8] sm:$0xff] %v151_v40 }

</bundles_post_ra>
